<compile_context>
chip_gen: v7x
topology: tpu7x:2x2x1
jax: 0.10.0
libtpu: 0.0.40
codegen_flags: <defaults>
</compile_context>

<pallas_src>
import jax
import jax.numpy as jnp
from jax import lax
from jax.experimental import pallas as pl
from jax.experimental.pallas import tpu as pltpu


def _round_up(n, m):
    return ((n + m - 1) // m) * m


def _pick_batch_tile(B, block_rows):
    """Batch tile: multiple of 8 (or full dim if B<=8), sized so the batch grid
    has >=2 steps (>=4 steps with tb>=256 when the batch is large enough)."""
    if B <= 8:
        return max(B, 1)
    tb = min(_round_up(block_rows, 8), _round_up(B, 8))
    quarter = _round_up(pl.cdiv(B, 4), 8)
    half = _round_up(pl.cdiv(B, 2), 8)
    if quarter >= 256:          # big batch: aim for >=4 steps, tb stays >=256
        tb = min(tb, quarter)
    else:                        # always guarantee >=2 steps
        tb = min(tb, half)
    return max(tb, 8)


def _const_spec(shape):
    """BlockSpec for a grid-invariant (VMEM-resident) operand; single-buffered
    when pipeline_mode is available in this JAX version."""
    idx = lambda i: (0,) * len(shape)
    try:
        return pl.BlockSpec(shape, idx, pipeline_mode=pl.Buffered(1))
    except (TypeError, AttributeError):
        return pl.BlockSpec(shape, idx)


def residual_block_kernel(x_ref, w_ref, b_ref, o_ref):
    """Fused tile: linear (x @ W^T + b) -> ReLU -> residual add -> ReLU."""
    x = x_ref[...]                                     # (TB, Wp) f32 (skip path)
    xc = x.astype(w_ref.dtype)                         # cast only the MXU operand
    # x @ W^T on the MXU: contract x dim 1 with weight dim 1 (torch (out, in)).
    h = lax.dot_general(
        xc, w_ref[...],
        dimension_numbers=(((1,), (1,)), ((), ())),
        preferred_element_type=jnp.float32)            # f32 accumulation
    h = jnp.maximum(h + b_ref[...], 0.0)               # bias + inner ReLU (f32)
    y = jnp.maximum(x + h, 0.0)                        # f32 residual + outer ReLU
    o_ref[...] = y.astype(o_ref.dtype)


def residual_block(x, weight, bias, *, block_rows=512,
                   compute_dtype=jnp.bfloat16, out_dtype=None):
    """
    x:      (B, W)  float32
    weight: (W, W)  float32, torch nn.Linear layout (out_features, in_features)
    bias:   (W,)    float32
    out_dtype: output dtype (default x.dtype); pass bf16 only if the consumer
               tolerates it (halves writeback traffic, changes semantics).
    """
    B, W = x.shape
    if out_dtype is None:
        out_dtype = x.dtype

    # Lane-dense feature dim. Padding passes over x only when W is ragged;
    # ragged batch is handled by Pallas partial last blocks (no pad, no slice).
    Wp = _round_up(W, 128)
    if Wp != W:
        x_in = jnp.pad(x, ((0, 0), (0, Wp - W)))
        weight = jnp.pad(weight, ((0, Wp - W), (0, Wp - W)))
        bias = jnp.pad(bias, (0, Wp - W))
    else:
        x_in = x                                        # f32, straight from HBM

    # Weight in compute dtype (bf16 halves its HBM/VMEM footprint); bias and
    # the whole elementwise epilogue stay f32 (v5e has no bf16 VPU anyway).
    w_c = weight.astype(compute_dtype)
    b_c = bias.reshape(1, Wp).astype(jnp.float32)

    tb = _pick_batch_tile(B, block_rows)
    grid = (pl.cdiv(B, tb),)

    # Explicit VMEM budget: 2x(x tile) + 2x(out tile) + (up to 2x) weight + bias
    # + headroom, capped under v7x's 64 MiB physical ceiling.
    cd = jnp.dtype(compute_dtype).itemsize
    x_tile = tb * Wp * jnp.dtype(x_in.dtype).itemsize
    o_tile = tb * Wp * jnp.dtype(out_dtype).itemsize
    w_buf = Wp * Wp * cd
    b_buf = Wp * 4
    vmem_needed = 2 * (x_tile + o_tile) + 2 * (w_buf + b_buf) + (4 << 20)
    vmem_limit = int(min(max(vmem_needed, 24 << 20), 56 << 20))

    out = pl.pallas_call(
        residual_block_kernel,
        out_shape=jax.ShapeDtypeStruct((B, Wp), out_dtype),
        grid_spec=pltpu.PrefetchScalarGridSpec(
            num_scalar_prefetch=0,
            grid=grid,
            in_specs=[
                pl.BlockSpec((tb, Wp), lambda i: (i, 0)),   # x tile (pipelined, f32)
                _const_spec((Wp, Wp)),                      # weight (VMEM-resident)
                _const_spec((1, Wp)),                       # bias   (VMEM-resident)
            ],
            out_specs=pl.BlockSpec((tb, Wp), lambda i: (i, 0)),
        ),
        compiler_params=pltpu.CompilerParams(
            # Batch tiles are independent -> shard across v7x's 2 TensorCores.
            dimension_semantics=("parallel",),
            vmem_limit_bytes=vmem_limit),
    )(x_in, w_c, b_c)

    if Wp != W:
        out = out[:, :W]
    return out


def residual_block_ref(x, weight, bias):
    """Pure-JAX f32 reference matching the PyTorch module."""
    h = jax.nn.relu(x @ weight.T + bias)
    return jax.nn.relu(x + h)


if __name__ == "__main__":
    key = jax.random.PRNGKey(0)

    # --- exact-precision check at tiny / ragged-W shape (exercises W padding) --
    batch_s, width_s = 8, 32
    k1, k2, k3, key = jax.random.split(key, 4)
    bound = 1.0 / (width_s ** 0.5)
    w_s = jax.random.uniform(k2, (width_s, width_s), jnp.float32, -bound, bound)
    b_s = jax.random.uniform(k3, (width_s,), jnp.float32, -bound, bound)
    x_s = jax.random.normal(k1, (batch_s, width_s), jnp.float32)

    out_s = jax.block_until_ready(
        residual_block(x_s, w_s, b_s, compute_dtype=jnp.float32))
    ref_s = residual_block_ref(x_s, w_s, b_s)
    assert out_s.shape == (batch_s, width_s)
    assert jnp.allclose(out_s, ref_s, atol=1e-5, rtol=1e-5), "f32 path mismatch"

    # --- lane-dense, multi-step batch grid, in-kernel bf16 matmul -------------
    batch, width = 512, 128
    k1, k2, k3, key = jax.random.split(key, 4)
    bound = 1.0 / (width ** 0.5)
    w = jax.random.uniform(k2, (width, width), jnp.float32, -bound, bound)
    b = jax.random.uniform(k3, (width,), jnp.float32, -bound, bound)
    x = jax.random.normal(k1, (batch, width), jnp.float32)

    out = jax.block_until_ready(residual_block(x, w, b))
    ref = residual_block_ref(x, w, b)
    assert out.shape == (batch, width)
    assert jnp.allclose(out, ref, atol=5e-2, rtol=5e-2), "bf16 path mismatch"

    # --- ragged batch, lane-dense W: no pad / no slice, masked last block -----
    batch_r = 300
    k1, key = jax.random.split(key)
    x_r = jax.random.normal(k1, (batch_r, width), jnp.float32)

    out_r = jax.block_until_ready(residual_block(x_r, w, b))
    ref_r = residual_block_ref(x_r, w, b)
    assert out_r.shape == (batch_r, width)
    assert jnp.allclose(out_r, ref_r, atol=5e-2, rtol=5e-2), "ragged-batch mismatch"

    print("KERNEL_OK")
</pallas_src>

<mosaic_0001>
module attributes {stable_mosaic.version = 11 : i64} {
  func.func @residual_block_kernel(%arg0: i32, %arg1: memref<8x128xf32, #tpu.memory_space<vmem>>, %arg2: memref<128x128xf32, #tpu.memory_space<vmem>>, %arg3: memref<1x128xf32, #tpu.memory_space<vmem>>, %arg4: memref<8x128xf32, #tpu.memory_space<vmem>>) attributes {dimension_semantics = [#tpu.dimension_semantics<parallel>], iteration_bounds = array<i64: 1>, scalar_prefetch = 0 : i64, scratch_operands = 0 : i64, tpu.core_type = #tpu.core_type<tc>, window_params = [{transform_indices = @transform_0, window_bounds = array<i64: 8, 128>}, {pipeline_mode = #tpu.pipeline_mode<synchronous>, transform_indices = @transform_1, window_bounds = array<i64: 128, 128>}, {pipeline_mode = #tpu.pipeline_mode<synchronous>, transform_indices = @transform_2, window_bounds = array<i64: 1, 128>}, {transform_indices = @transform_3, window_bounds = array<i64: 8, 128>}]} {
    %c0 = arith.constant 0 : index
    %c0_0 = arith.constant 0 : index
    %0 = vector.load %arg1[%c0, %c0_0] : memref<8x128xf32, #tpu.memory_space<vmem>>, vector<8x128xf32>
    %c0_1 = arith.constant 0 : index
    %c0_2 = arith.constant 0 : index
    %1 = vector.load %arg2[%c0_1, %c0_2] : memref<128x128xf32, #tpu.memory_space<vmem>>, vector<128x128xf32>
    %cst = arith.constant dense<0.000000e+00> : vector<8x128xf32>
    %2 = tpu.matmul %0, %1, %cst {dimension_numbers = #tpu.dot_dimension_numbers<[1], [1], [0], [0], [0, 0, 1, 0], [], []>} : vector<8x128xf32>, vector<128x128xf32>, vector<8x128xf32> -> vector<8x128xf32>
    %c0_3 = arith.constant 0 : index
    %c0_4 = arith.constant 0 : index
    %3 = vector.load %arg3[%c0_3, %c0_4] : memref<1x128xf32, #tpu.memory_space<vmem>>, vector<1x128xf32>
    %4 = vector.broadcast %3 : vector<1x128xf32> to vector<8x128xf32>
    %5 = arith.addf %2, %4 : vector<8x128xf32>
    %cst_5 = arith.constant 0.000000e+00 : f32
    %6 = vector.broadcast %cst_5 : f32 to vector<8x128xf32>
    %7 = arith.maximumf %5, %6 : vector<8x128xf32>
    %8 = arith.addf %0, %7 : vector<8x128xf32>
    %cst_6 = arith.constant 0.000000e+00 : f32
    %9 = vector.broadcast %cst_6 : f32 to vector<8x128xf32>
    %10 = arith.maximumf %8, %9 : vector<8x128xf32>
    %c0_7 = arith.constant 0 : index
    %c0_8 = arith.constant 0 : index
    %11 = vector.load %arg4[%c0_7, %c0_8] : memref<8x128xf32, #tpu.memory_space<vmem>>, vector<8x128xf32>
    tpu.vector_store %arg4[%c0_7, %c0_8], %10 {strides = array<i32>} : memref<8x128xf32, #tpu.memory_space<vmem>>, vector<8x128xf32>,
    return
  }
  func.func @transform_0(%arg0: i32) -> (i32, i32) {
    %c0_i32 = arith.constant 0 : i32
    %c0_i32_0 = arith.constant 0 : i32
    return %arg0, %c0_i32 : i32, i32
  }
  func.func @transform_1(%arg0: i32) -> (i32, i32) {
    %c0_i32 = arith.constant 0 : i32
    %c0_i32_0 = arith.constant 0 : i32
    %c0_i32_1 = arith.constant 0 : i32
    return %c0_i32, %c0_i32_0 : i32, i32
  }
  func.func @transform_2(%arg0: i32) -> (i32, i32) {
    %c0_i32 = arith.constant 0 : i32
    %c0_i32_0 = arith.constant 0 : i32
    %c0_i32_1 = arith.constant 0 : i32
    return %c0_i32, %c0_i32_0 : i32, i32
  }
  func.func @transform_3(%arg0: i32) -> (i32, i32) {
    %c0_i32 = arith.constant 0 : i32
    %c0_i32_0 = arith.constant 0 : i32
    return %arg0, %c0_i32 : i32, i32
  }
}

</mosaic_0001>

<bundles_post_ra>
// kernel: tpu_custom_call.1
= control target key start
LH: loop header
LB: loop body
LE: loop exit
PB: predicated region body
PF: predicated region fallthrough
CT: control target
= control target key end

     0   :  { %8 = vsyncpa [#allocation3], 0  ;;  %s386_s0 = inlined_call_operand.hbm [shape: f32[8,128], index: 0, kind: input, shape index: {}]   ;;  %s387_s1 = inlined_call_operand.hbm [shape: f32[128,128], index: 1, kind: input, shape index: {}]   ;;  %s388_s2 = inlined_call_operand.vmem [shape: f32[1,128], index: 2, kind: input, shape index: {}]   ;;  %s389_s3 = inlined_call_operand.hbm [shape: f32[8,128], index: 3, kind: output, shape index: {}]  }
   0x1   :  { %9 = vsyncpa [#allocation6], 0 }
   0x2   :  { %10 = vsyncpa [#allocation4], 0  ;;  %s312_s12 = smov [#allocation2]   ;;  %s313_s14 = smov [#allocation5]  }
   0x3   :  { %s17_s13 = sshll.u32 %s312_s12, 4  ;;  %s26_s15 = sshll.u32 %s313_s14, 4  ;;  %s18_s13 = int_to_ptr.vmem [resolvable:$true] %s17_s13  ;;  %s340_s15 = int_to_ptr.vmem [resolvable:$true] %s26_s15 }
   0x4   :  { %s240_s18 = scalar_lea.hbm %s386_s0, 128 }
   0x5   :  { %p241_p0 = scmp.ne.s32.totalorder %s386_s0, %s240_s18  ;;  %p244_p1 = scmp.lt.u32.totalorder %s240_s18, %s386_s0 }
   0x7   :  { %p246_p2 = pnand %p244_p1, %p241_p0 }
   0x9   :  { %249 = shalt.err (!%p246_p2)
}
   0xa   :  { %s250_s23 = scalar_lea.vmem %s18_s13, 128  ;;  %p255_p4 = scmp.lt.s32.totalorder %s18_s13, %s18_s13 }
   0xb   :  { %p251_p3 = scmp.ne.s32.totalorder %s18_s13, %s250_s23  ;;  %p256_p5 = scmp.lt.s32.totalorder %s250_s23, %s250_s23 }
   0xd   :  { %p257_p6 = por %p256_p5, %p255_p4 }
   0xf   :  { %p258_p7 = pnand %p257_p6, %p251_p3 }
  0x11   :  { %261 = shalt.err (!%p258_p7)
}
  0x12   :  { %20 = dma.hbm_to_vmem [thread:$0]  %s386_s0, 128, %s18_s13, [#allocation3]  }
  0x13   :  { %s262_s28 = scalar_lea.hbm %s387_s1, 2048 }
  0x14   :  { %p263_p8 = scmp.ne.s32.totalorder %s387_s1, %s262_s28  ;;  %p266_p9 = scmp.lt.u32.totalorder %s262_s28, %s387_s1 }
  0x16   :  { %p268_p10 = pnand %p266_p9, %p263_p8 }
  0x18   :  { %271 = shalt.err (!%p268_p10)
}
  0x19   :  { %s272_s6 = scalar_lea.vmem %s340_s15, 2048  ;;  %p277_p12 = scmp.lt.s32.totalorder %s340_s15, %s340_s15 }
  0x1a   :  { %p273_p11 = scmp.ne.s32.totalorder %s340_s15, %s272_s6  ;;  %p278_p13 = scmp.lt.s32.totalorder %s272_s6, %s272_s6 }
  0x1c   :  { %p279_p0 = por %p278_p13, %p277_p12 }
  0x1e   :  { %p280_p1 = pnand %p279_p0, %p273_p11 }
  0x20   :  { %283 = shalt.err (!%p280_p1)
}
  0x21   :  { %s314_s0 = smov 128   ;;  %s315_s7 = smov 8  }
  0x22   :  { %32 = dma.hbm_to_vmem [thread:$0]  %s387_s1, 2048, %s340_s15, [#allocation6], %s314_s0, %s314_s0, %s315_s7  }
  0x23   :  { %306 = dma.done.wait [#allocation3], 128  }
  0x24   :  { %307 = vsyncadd [#allocation3], 4294967168 }
  0x25   :  { %308 = dma.done.wait [#allocation6], 2048  }
  0x26   :  { %309 = vsyncadd [#allocation6], 4294965248  ;;  %v316_v0 = vmov 0.0|0.0   ;;  %vm317_vm0 = vmmov 0   ;;  %v318_v1 = vmov 0.0   ;;  %v42_v2 = vld [vmem:[#allocation5] sm:$0xff] }
  0x27   :  { %208 = vmatprep.subr.bf16.mxu0 %v316_v0  ;;  %205 = vmatprep.mubr.msk.f32.mxu0 %vm317_vm0, %v318_v1  ;;  %v43_v3 = vld [vmem:[#allocation5 + $0x8] sm:$0xff]  ;;  %v44_v5 = vld [vmem:[#allocation5 + $0x10] sm:$0xff]  ;;  %v45_v6 = vld [vmem:[#allocation5 + $0x18] sm:$0xff]  ;;  %s319_s11 = smov [#allocation7]  }
  0x28   :  { %v209_v4 = vpack.c.bf16 %v43_v3, %v42_v2  ;;  %v212_v7 = vpack.c.bf16 %v45_v6, %v44_v5  ;;  %v46_v8 = vld [vmem:[#allocation5 + $0x20] sm:$0xff]  ;;  %v47_v9 = vld [vmem:[#allocation5 + $0x28] sm:$0xff]  ;;  %v48_v11 = vld [vmem:[#allocation5 + $0x30] sm:$0xff]  ;;  %s145_s12 = sshll.u32 %s319_s11, 4  ;;  %s146_s12 = int_to_ptr.vmem [resolvable:$true] %s145_s12 }
  0x29   :  { %v215_v10 = vpack.c.bf16 %v47_v9, %v46_v8  ;;  %v49_v12 = vld [vmem:[#allocation5 + $0x38] sm:$0xff]  ;;  %v50_v14 = vld [vmem:[#allocation5 + $0x40] sm:$0xff]  ;;  %v51_v15 = vld [vmem:[#allocation5 + $0x48] sm:$0xff]  ;;  %s284_s13 = scalar_lea.vmem %s146_s12, 128  ;;  %p289_p3 = scmp.lt.s32.totalorder %s146_s12, %s146_s12 }
  0x2a   :  { %210 = vmatpush3.bf16.xpose.msra.mxu0 %v209_v4  ;;  %v218_v13 = vpack.c.bf16 %v49_v12, %v48_v11  ;;  %v221_v16 = vpack.c.bf16 %v51_v15, %v50_v14  ;;  %v52_v17 = vld [vmem:[#allocation5 + $0x50] sm:$0xff]  ;;  %v53_v18 = vld [vmem:[#allocation5 + $0x58] sm:$0xff]  ;;  %v54_v20 = vld [vmem:[#allocation5 + $0x60] sm:$0xff]  ;;  %p285_p2 = scmp.ne.s32.totalorder %s146_s12, %s284_s13  ;;  %p290_p4 = scmp.lt.s32.totalorder %s284_s13, %s284_s13 }
  0x2b   :  { %211 = vmatprep.subr.bf16.mxu0 %v316_v0  ;;  %v224_v19 = vpack.c.bf16 %v53_v18, %v52_v17  ;;  %v55_v21 = vld [vmem:[#allocation5 + $0x68] sm:$0xff]  ;;  %v56_v23 = vld [vmem:[#allocation5 + $0x70] sm:$0xff]  ;;  %v57_v24 = vld [vmem:[#allocation5 + $0x78] sm:$0xff] }
  0x2c   :  { %v227_v22 = vpack.c.bf16 %v55_v21, %v54_v20  ;;  %v230_v25 = vpack.c.bf16 %v57_v24, %v56_v23  ;;  %v41_v26 = vld [vmem:[#allocation2] sm:$0xff]  ;;  %p291_p5 = por %p290_p4, %p289_p3 }
  0x2d   :  { %v155_v27 = vld [vmem:[%s388_s2] ss:$0 sm:$0xff] }
  0x2e   :  { %p292_p6 = pnand %p291_p5, %p285_p2 }
  0x32   :  { %213 = vmatpush3.bf16.xpose.msra.mxu0 %v212_v7 }
  0x33   :  { %214 = vmatprep.subr.bf16.mxu0 %v316_v0 }
  0x3a   :  { %216 = vmatpush3.bf16.xpose.msra.mxu0 %v215_v10 }
  0x3b   :  { %217 = vmatprep.subr.bf16.mxu0 %v316_v0 }
  0x42   :  { %219 = vmatpush3.bf16.xpose.msra.mxu0 %v218_v13 }
  0x43   :  { %220 = vmatprep.subr.bf16.mxu0 %v316_v0 }
  0x4a   :  { %222 = vmatpush3.bf16.xpose.msra.mxu0 %v221_v16 }
  0x4b   :  { %223 = vmatprep.subr.bf16.mxu0 %v316_v0 }
  0x52   :  { %225 = vmatpush3.bf16.xpose.msra.mxu0 %v224_v19 }
  0x53   :  { %226 = vmatprep.subr.bf16.mxu0 %v316_v0 }
  0x5a   :  { %228 = vmatpush3.bf16.xpose.msra.mxu0 %v227_v22 }
  0x5b   :  { %229 = vmatprep.subr.bf16.mxu0 %v316_v0 }
  0x62   :  { %231 = vmatpush3.bf16.xpose.msra.mxu0 %v230_v25 }
  0x69   :  { %206 = vmatmul.mubr.f32.vlgmr.msra.gmra.mrb[0].mxu0 %v41_v26 }
 0x13c   :  { %v131_v28 = vpop.f32.mrb[0].mxu0 }
 0x13d   :  { %v132_v29 = vadd.f32 %v155_v27, %v131_v28  ;;  %v207_v30 = vpop.f32.mrb[1].mxu0 }
 0x13f   :  { %v135_v31 = vmax.f32 %v132_v29, 0.0 }
 0x141   :  { %v136_v32 = vadd.f32 %v135_v31, %v41_v26 }
 0x143   :  { %v137_v33 = vmax.f32 %v136_v32, 0.0 }
 0x145   :  { %138 = vst [vmem:[#allocation7] sm:$0xff] %v137_v33 }
 0x146   :  { %295 = shalt.err (!%p292_p6)
}
 0x147   :  { %s296_s2 = scalar_lea.hbm %s389_s3, 128 }
 0x148   :  { %p297_p7 = scmp.ne.s32.totalorder %s389_s3, %s296_s2  ;;  %p300_p8 = scmp.lt.u32.totalorder %s296_s2, %s389_s3 }
 0x14a   :  { %p302_p9 = pnand %p300_p8, %p297_p7 }
 0x14c   :  { %305 = shalt.err (!%p302_p9)
}
 0x14d   :  { %148 = dma.vmem_to_hbm [thread:$0]  %s146_s12, 128, %s389_s3, [#allocation4]  }
 0x14e   :  { %310 = dma.done.wait [#allocation4], 128  }
 0x14f   :  { %311 = vsyncadd [#allocation4], 4294967168 }
 0x150   :  { %152 = vsyncpa [#allocation3], 1 }
 0x151   :  { %153 = vsyncpa [#allocation6], 1 }
 0x152   :  { %154 = vsyncpa [#allocation4], 1 }

</bundles_post_ra>
